<compile_context>
chip_gen: v6e
topology: v6e:2x2x1
jax: 0.10.0
libtpu: 0.0.40
codegen_flags: <defaults>
</compile_context>

<pallas_src>
import jax
import jax.numpy as jnp
from jax.experimental import pallas as pl
from jax.experimental.pallas import tpu as pltpu


def _round_up(x, m):
    return (x + m - 1) // m * m


def _device_kind():
    try:
        return jax.devices()[0].device_kind.lower()
    except Exception:
        return ""


def _chip_defaults():
    """Per-generation tile defaults + VMEM cap (bytes) + TensorCore count."""
    kind = _device_kind()
    if "v5" in kind:   # ~240 FLOP/B compute-bound threshold; small scoped VMEM default
        return dict(tm=512, tn=512, tk=1024, vmem_cap=96 << 20, cores=1)
    if "v6" in kind:   # ~700 FLOP/B threshold; 128 MiB physical VMEM
        return dict(tm=1024, tn=2048, tk=1024, vmem_cap=96 << 20, cores=1)
    if "v7" in kind:   # ~310 FLOP/B threshold; only 64 MiB VMEM; 2 TCs/chip
        return dict(tm=512, tn=1024, tk=1024, vmem_cap=44 << 20, cores=2)
    return dict(tm=512, tn=1024, tk=512, vmem_cap=44 << 20, cores=1)


# ----------------------------------------------------------------------------
# Kernels: fused down_proj matmul + RED intervention (+ optional residual)
# ----------------------------------------------------------------------------
def _rep_layer_kernel(x_ref, w_ref, scale_ref, bias_ref, o_ref, acc_ref):
    # x_ref: (tm, tk) bf16 | w_ref: (tk, tn) bf16 (pre-transposed, NN contraction)
    # scale_ref/bias_ref: (1, tn) f32 | o_ref: (tm, tn) | acc_ref: (tm, tn) f32
    k = pl.program_id(2)

    @pl.when(k == 0)
    def _():
        acc_ref[...] = jnp.zeros_like(acc_ref)

    acc_ref[...] += jnp.dot(x_ref[...], w_ref[...],
                            preferred_element_type=jnp.float32)

    @pl.when(k == pl.num_programs(2) - 1)
    def _():
        h = acc_ref[...] * scale_ref[...] + bias_ref[...]
        o_ref[...] = h.astype(o_ref.dtype)


def _rep_layer_residual_kernel(x_ref, w_ref, scale_ref, bias_ref, res_ref,
                               o_ref, acc_ref):
    k = pl.program_id(2)

    @pl.when(k == 0)
    def _():
        acc_ref[...] = jnp.zeros_like(acc_ref)

    acc_ref[...] += jnp.dot(x_ref[...], w_ref[...],
                            preferred_element_type=jnp.float32)

    @pl.when(k == pl.num_programs(2) - 1)
    def _():
        h = acc_ref[...] * scale_ref[...] + bias_ref[...]
        h = h + res_ref[...].astype(jnp.float32)
        o_ref[...] = h.astype(o_ref.dtype)


# ----------------------------------------------------------------------------
# One-time weight preparation (hoisted out of the per-call hot path)
# ----------------------------------------------------------------------------
def prepare_representation_params(w_down, scale, bias, *,
                                  compute_dtype=jnp.bfloat16, tiles=None):
    """Prepare the replaced down_proj once at parameter-load time.

    w_down: (N, K) PyTorch nn.Linear weight (out_features, in_features)
    scale:  (N,)   RED scaling vector
    bias:   (N,)   RED bias vector
    Returns a dict with the bf16, transposed-(K,N), tile-padded weight and
    padded (1, Np) scale/bias, plus the tiling chosen for this chip.
    """
    N, K = w_down.shape
    cfg = _chip_defaults()
    tm, tn, tk = (tiles if tiles is not None
                  else (cfg["tm"], cfg["tn"], cfg["tk"]))
    tn = min(tn, _round_up(N, 128))
    tk = min(tk, _round_up(K, 128))
    Np, Kp = _round_up(N, tn), _round_up(K, tk)

    # One-time cast + transpose + pad (amortized over all forward calls).
    w_kn = jnp.asarray(w_down, compute_dtype).T          # (K, N)
    if (Kp, Np) != (K, N):
        w_kn = jnp.pad(w_kn, ((0, Kp - K), (0, Np - N)))
    scale2d = jnp.asarray(scale, jnp.float32).reshape(1, N)
    bias2d = jnp.asarray(bias, jnp.float32).reshape(1, N)
    if Np != N:
        scale2d = jnp.pad(scale2d, ((0, 0), (0, Np - N)))
        bias2d = jnp.pad(bias2d, ((0, 0), (0, Np - N)))

    return dict(w_kn=w_kn, scale=scale2d, bias=bias2d,
                N=N, K=K, Np=Np, Kp=Kp,
                tm_hint=tm, tn=tn, tk=tk,
                compute_dtype=compute_dtype,
                vmem_cap=cfg["vmem_cap"], cores=cfg["cores"])


# ----------------------------------------------------------------------------
# Fused RepresentationLayer forward
# ----------------------------------------------------------------------------
def representation_layer(x, prep, residual=None):
    """y = (x @ W_down^T) * scale + bias  [+ residual], fused in one kernel.

    x:        (B, S, K) activations entering down_proj
    prep:     output of prepare_representation_params (preprocessed weight)
    residual: optional (B, S, N) tensor fused into the epilogue
    returns   (B, S, N) with dtype of x (bf16 compute, f32 accumulation)
    """
    B, S, K = x.shape
    assert K == prep["K"], "weight in_features must match activation dim"
    M = B * S
    N, Np, Kp = prep["N"], prep["Np"], prep["Kp"]
    tn, tk = prep["tn"], prep["tk"]
    cd = prep["compute_dtype"]
    out_dtype = x.dtype

    tm = min(prep["tm_hint"], _round_up(M, 16))
    Mp = _round_up(M, tm)
    # Keep both TensorCores busy on 2-TC chips: ensure >= 2 parallel grid steps
    # when the problem allows it.
    while (prep["cores"] > 1 and (Mp // tm) * (Np // tn) < prep["cores"]
           and tm > 16):
        tm = max(16, _round_up(tm // 2, 16))
        Mp = _round_up(M, tm)

    x2d = x.reshape(M, K).astype(cd)
    if (Mp, Kp) != (M, K):   # K-pad required for reduction correctness
        x2d = jnp.pad(x2d, ((0, Mp - M), (0, Kp - K)))

    args = [x2d, prep["w_kn"], prep["scale"], prep["bias"]]
    in_specs = [
        pl.BlockSpec((tm, tk), lambda i, j, k: (i, k)),   # activations
        pl.BlockSpec((tk, tn), lambda i, j, k: (k, j)),   # weight (K, N), NN
        pl.BlockSpec((1, tn), lambda i, j, k: (0, j)),    # RED scale
        pl.BlockSpec((1, tn), lambda i, j, k: (0, j)),    # RED bias
    ]
    kernel = _rep_layer_kernel
    res_vmem = 0
    res_hbm = 0
    if residual is not None:
        res2d = residual.reshape(M, N)
        if (Mp, Np) != (M, N):
            res2d = jnp.pad(res2d, ((0, Mp - M), (0, Np - N)))
        args.append(res2d)
        # Same (i, j) block across all k steps -> fetched once per output tile.
        in_specs.append(pl.BlockSpec((tm, tn), lambda i, j, k: (i, j)))
        kernel = _rep_layer_residual_kernel
        res_vmem = 2 * tm * tn * res2d.dtype.itemsize
        res_hbm = M * N * res2d.dtype.itemsize

    grid = (Mp // tm, Np // tn, Kp // tk)

    in_b = jnp.dtype(cd).itemsize
    out_b = jnp.dtype(out_dtype).itemsize
    vmem_est = (2 * (tm * tk + tk * tn) * in_b   # double-buffered matmul inputs
                + 2 * 2 * tn * 4                 # scale + bias tiles
                + tm * tn * 4                    # f32 accumulator
                + 2 * tm * tn * out_b            # double-buffered output
                + res_vmem)                      # fused residual tile
    vmem_limit = int(min(vmem_est + (8 << 20), prep["vmem_cap"]))

    flops = 2 * M * K * N
    bytes_accessed = ((M * K + N * K) * in_b + M * N * out_b
                      + 2 * N * 4 + res_hbm)

    out2d = pl.pallas_call(
        kernel,
        out_shape=jax.ShapeDtypeStruct((Mp, Np), out_dtype),
        grid_spec=pltpu.PrefetchScalarGridSpec(
            num_scalar_prefetch=0,
            grid=grid,
            in_specs=in_specs,
            out_specs=pl.BlockSpec((tm, tn), lambda i, j, k: (i, j)),
            scratch_shapes=[pltpu.VMEM((tm, tn), jnp.float32)],
        ),
        compiler_params=pltpu.CompilerParams(
            dimension_semantics=("parallel", "parallel", "arbitrary"),
            vmem_limit_bytes=vmem_limit,
        ),
        cost_estimate=pl.CostEstimate(
            flops=int(flops),
            transcendentals=0,
            bytes_accessed=int(bytes_accessed),
        ),
    )(*args)

    return out2d[:M, :N].reshape(B, S, N)


# ----------------------------------------------------------------------------
# Minimal JAX mirror of the RepresentationModel wrapper: a toy Llama-style FFN
# whose down_proj has been replaced by the fused Pallas RepresentationLayer.
# The residual add is fused into the kernel epilogue.
# ----------------------------------------------------------------------------
def representation_model_forward(hidden, params, prep):
    gate = hidden @ params["w_gate"].T                 # (B, S, I) frozen glue
    up = hidden @ params["w_up"].T                     # (B, S, I) frozen glue
    inter = jax.nn.silu(gate) * up                     # (B, S, I)
    # Replaced layer: down_proj + RED intervention + residual, fused in Pallas.
    return representation_layer(inter, prep, residual=hidden)


def reference_forward(hidden, params):
    gate = hidden @ params["w_gate"].T
    up = hidden @ params["w_up"].T
    inter = jax.nn.silu(gate) * up
    h = inter @ params["w_down"].T
    h = h * params["red_scale"] + params["red_bias"]
    return hidden + h


if __name__ == "__main__":
    # Small shapes consistent with a decoder FFN: batch=2, seq=8,
    # hidden=32, intermediate=64.
    B, S, H, I = 2, 8, 32, 64

    key = jax.random.PRNGKey(0)
    k_x, k_g, k_u, k_d, k_s, k_b = jax.random.split(key, 6)

    hidden = jax.random.normal(k_x, (B, S, H), dtype=jnp.float32)
    params = {
        "w_gate": jax.random.normal(k_g, (I, H), dtype=jnp.float32) * 0.05,
        "w_up": jax.random.normal(k_u, (I, H), dtype=jnp.float32) * 0.05,
        "w_down": jax.random.normal(k_d, (H, I), dtype=jnp.float32) * 0.05,
        # RED intervention parameters (l_vector init ~1, b_vector init ~0,
        # perturbed so the fused elementwise path is actually exercised)
        "red_scale": 1.0 + 0.1 * jax.random.normal(k_s, (H,), dtype=jnp.float32),
        "red_bias": 0.1 * jax.random.normal(k_b, (H,), dtype=jnp.float32),
    }

    # One-time weight preprocessing (would happen at checkpoint-load time).
    prep = prepare_representation_params(
        params["w_down"], params["red_scale"], params["red_bias"]
    )
    prep = jax.block_until_ready(prep)

    out = representation_model_forward(hidden, params, prep)
    out = jax.block_until_ready(out)

    ref = reference_forward(hidden, params)
    assert out.shape == (B, S, H)
    # bf16 operands / f32 accumulation -> loosened tolerance vs f32 reference.
    assert jnp.allclose(out, ref, atol=5e-3, rtol=5e-3), "mismatch vs reference"

    # TODO(synk): module-surgery, save/load, freezing and generate() paths of
    # RepresentationModel are checkpoint plumbing with no numerical content.
    print("KERNEL_OK")
</pallas_src>

<mosaic_0001>
module attributes {stable_mosaic.version = 11 : i64} {
  func.func @_rep_layer_residual_kernel(%arg0: i32, %arg1: i32, %arg2: i32, %arg3: memref<16x128xbf16, #tpu.memory_space<vmem>>, %arg4: memref<128x128xbf16, #tpu.memory_space<vmem>>, %arg5: memref<1x128xf32, #tpu.memory_space<vmem>>, %arg6: memref<1x128xf32, #tpu.memory_space<vmem>>, %arg7: memref<16x128xf32, #tpu.memory_space<vmem>>, %arg8: memref<16x128xf32, #tpu.memory_space<vmem>>, %arg9: memref<16x128xf32, #tpu.memory_space<vmem>>) attributes {dimension_semantics = [#tpu.dimension_semantics<parallel>, #tpu.dimension_semantics<parallel>, #tpu.dimension_semantics<arbitrary>], iteration_bounds = array<i64: 1, 1, 1>, scalar_prefetch = 0 : i64, scratch_operands = 1 : i64, tpu.core_type = #tpu.core_type<tc>, window_params = [{transform_indices = @transform_0, window_bounds = array<i64: 16, 128>}, {transform_indices = @transform_1, window_bounds = array<i64: 128, 128>}, {transform_indices = @transform_2, window_bounds = array<i64: 1, 128>}, {transform_indices = @transform_3, window_bounds = array<i64: 1, 128>}, {transform_indices = @transform_4, window_bounds = array<i64: 16, 128>}, {transform_indices = @transform_5, window_bounds = array<i64: 16, 128>}]} {
    %c0_i32 = arith.constant 0 : i32
    %0 = arith.cmpi eq, %arg2, %c0_i32 : i32
    %1 = arith.extui %0 : i1 to i32
    %c0_i32_0 = arith.constant 0 : i32
    %2 = arith.cmpi ne, %1, %c0_i32_0 : i32
    scf.if %2 {
      %cst_10 = arith.constant 0.000000e+00 : f32
      %12 = vector.broadcast %cst_10 : f32 to vector<16x128xf32>
      %c0_11 = arith.constant 0 : index
      %c0_12 = arith.constant 0 : index
      %13 = vector.load %arg9[%c0_11, %c0_12] : memref<16x128xf32, #tpu.memory_space<vmem>>, vector<16x128xf32>
      tpu.vector_store %arg9[%c0_11, %c0_12], %12 {strides = array<i32>} : memref<16x128xf32, #tpu.memory_space<vmem>>, vector<16x128xf32>,
    } else {
    }
    %c0 = arith.constant 0 : index
    %c0_1 = arith.constant 0 : index
    %3 = vector.load %arg9[%c0, %c0_1] : memref<16x128xf32, #tpu.memory_space<vmem>>, vector<16x128xf32>
    %c0_2 = arith.constant 0 : index
    %c0_3 = arith.constant 0 : index
    %4 = vector.load %arg3[%c0_2, %c0_3] : memref<16x128xbf16, #tpu.memory_space<vmem>>, vector<16x128xbf16>
    %c0_4 = arith.constant 0 : index
    %c0_5 = arith.constant 0 : index
    %5 = vector.load %arg4[%c0_4, %c0_5] : memref<128x128xbf16, #tpu.memory_space<vmem>>, vector<128x128xbf16>
    %cst = arith.constant dense<0.000000e+00> : vector<16x128xf32>
    %6 = tpu.matmul %4, %5, %cst {dimension_numbers = #tpu.dot_dimension_numbers<[1], [0], [0], [1], [0, 0, 1, 1], [], []>} : vector<16x128xbf16>, vector<128x128xbf16>, vector<16x128xf32> -> vector<16x128xf32>
    %7 = arith.addf %3, %6 : vector<16x128xf32>
    %c0_6 = arith.constant 0 : index
    %c0_7 = arith.constant 0 : index
    %8 = vector.load %arg9[%c0_6, %c0_7] : memref<16x128xf32, #tpu.memory_space<vmem>>, vector<16x128xf32>
    tpu.vector_store %arg9[%c0_6, %c0_7], %7 {strides = array<i32>} : memref<16x128xf32, #tpu.memory_space<vmem>>, vector<16x128xf32>,
    %c0_i32_8 = arith.constant 0 : i32
    %9 = arith.cmpi eq, %arg2, %c0_i32_8 : i32
    %10 = arith.extui %9 : i1 to i32
    %c0_i32_9 = arith.constant 0 : i32
    %11 = arith.cmpi ne, %10, %c0_i32_9 : i32
    scf.if %11 {
      %c0_10 = arith.constant 0 : index
      %c0_11 = arith.constant 0 : index
      %12 = vector.load %arg9[%c0_10, %c0_11] : memref<16x128xf32, #tpu.memory_space<vmem>>, vector<16x128xf32>
      %c0_12 = arith.constant 0 : index
      %c0_13 = arith.constant 0 : index
      %13 = vector.load %arg5[%c0_12, %c0_13] : memref<1x128xf32, #tpu.memory_space<vmem>>, vector<1x128xf32>
      %14 = vector.broadcast %13 : vector<1x128xf32> to vector<16x128xf32>
      %15 = arith.mulf %12, %14 : vector<16x128xf32>
      %c0_14 = arith.constant 0 : index
      %c0_15 = arith.constant 0 : index
      %16 = vector.load %arg6[%c0_14, %c0_15] : memref<1x128xf32, #tpu.memory_space<vmem>>, vector<1x128xf32>
      %17 = vector.broadcast %16 : vector<1x128xf32> to vector<16x128xf32>
      %18 = arith.addf %15, %17 : vector<16x128xf32>
      %c0_16 = arith.constant 0 : index
      %c0_17 = arith.constant 0 : index
      %19 = vector.load %arg7[%c0_16, %c0_17] : memref<16x128xf32, #tpu.memory_space<vmem>>, vector<16x128xf32>
      %20 = arith.addf %18, %19 : vector<16x128xf32>
      %c0_18 = arith.constant 0 : index
      %c0_19 = arith.constant 0 : index
      %21 = vector.load %arg8[%c0_18, %c0_19] : memref<16x128xf32, #tpu.memory_space<vmem>>, vector<16x128xf32>
      tpu.vector_store %arg8[%c0_18, %c0_19], %20 {strides = array<i32>} : memref<16x128xf32, #tpu.memory_space<vmem>>, vector<16x128xf32>,
    } else {
    }
    return
  }
  func.func @transform_0(%arg0: i32, %arg1: i32, %arg2: i32) -> (i32, i32) {
    %c0_i32 = arith.constant 0 : i32
    return %arg0, %arg2 : i32, i32
  }
  func.func @transform_1(%arg0: i32, %arg1: i32, %arg2: i32) -> (i32, i32) {
    %c0_i32 = arith.constant 0 : i32
    return %arg2, %arg1 : i32, i32
  }
  func.func @transform_2(%arg0: i32, %arg1: i32, %arg2: i32) -> (i32, i32) {
    %c0_i32 = arith.constant 0 : i32
    %c0_i32_0 = arith.constant 0 : i32
    return %c0_i32, %arg1 : i32, i32
  }
  func.func @transform_3(%arg0: i32, %arg1: i32, %arg2: i32) -> (i32, i32) {
    %c0_i32 = arith.constant 0 : i32
    %c0_i32_0 = arith.constant 0 : i32
    return %c0_i32, %arg1 : i32, i32
  }
  func.func @transform_4(%arg0: i32, %arg1: i32, %arg2: i32) -> (i32, i32) {
    %c0_i32 = arith.constant 0 : i32
    return %arg0, %arg1 : i32, i32
  }
  func.func @transform_5(%arg0: i32, %arg1: i32, %arg2: i32) -> (i32, i32) {
    %c0_i32 = arith.constant 0 : i32
    return %arg0, %arg1 : i32, i32
  }
}

</mosaic_0001>

<bundles_post_ra>
// kernel: tpu_custom_call.1
= control target key start
LH: loop header
LB: loop body
LE: loop exit
PB: predicated region body
PF: predicated region fallthrough
CT: control target
= control target key end

     0   :  { %10 = vsyncpa [#allocation4], 0  ;;  %s444_s0 = inlined_call_operand.hbm [shape: bf16[16,128], index: 0, kind: input, shape index: {}]   ;;  %s445_s1 = inlined_call_operand.hbm [shape: bf16[128,128], index: 1, kind: input, shape index: {}]   ;;  %s446_s2 = inlined_call_operand.vmem [shape: f32[1,128], index: 2, kind: input, shape index: {}]   ;;  %s447_s3 = inlined_call_operand.vmem [shape: f32[1,128], index: 3, kind: input, shape index: {}]   ;;  %s448_s4 = inlined_call_operand.hbm [shape: f32[16,128], index: 4, kind: input, shape index: {}]   ;;  %s449_s5 = inlined_call_operand.hbm [shape: f32[16,128], index: 5, kind: output, shape index: {}]  }
   0x1   :  { %11 = vsyncpa [#allocation7], 0 }
   0x2   :  { %12 = vsyncpa [#allocation5], 0  ;;  %s380_s18 = smov [#allocation6]   ;;  %s381_s20 = smov [#allocation3]  }
   0x3   :  { %s30_s19 = sshll.u32 %s380_s18, 4  ;;  %s18_s21 = sshll.u32 %s381_s20, 4  ;;  %s31_s19 = int_to_ptr.vmem [resolvable:$true] %s30_s19  ;;  %s19_s21 = int_to_ptr.vmem [resolvable:$true] %s18_s21 }
   0x4   :  { %s302_s22 = scalar_lea.vmem %s31_s19, 1024  ;;  %p307_p1 = scmp.lt.s32.totalorder %s31_s19, %s31_s19 }
   0x5   :  { %p303_p0 = scmp.ne.s32.totalorder %s31_s19, %s302_s22  ;;  %p308_p2 = scmp.lt.s32.totalorder %s302_s22, %s302_s22 }
   0x7   :  { %p309_p3 = por %p308_p2, %p307_p1 }
   0x9   :  { %p310_p4 = pnand %p309_p3, %p303_p0 }
   0xb   :  { %313 = shalt.err (!%p310_p4)
}
   0xc   :  { %s382_s23 = smov 64   ;;  %s383_s24 = smov 4  }
   0xd   :  { %36 = dma.hbm_to_vmem [thread:$0]  %s445_s1, 1024, %s31_s19, [#allocation7], %s382_s23, %s382_s23, %s383_s24  }
   0xe   :  { %s322_s27 = scalar_lea.vmem %s19_s21, 128  ;;  %p327_p6 = scmp.lt.s32.totalorder %s19_s21, %s19_s21 }
   0xf   :  { %p323_p5 = scmp.ne.s32.totalorder %s19_s21, %s322_s27  ;;  %p328_p7 = scmp.lt.s32.totalorder %s322_s27, %s322_s27 }
  0x11   :  { %p329_p8 = por %p328_p7, %p327_p6 }
  0x13   :  { %p330_p9 = pnand %p329_p8, %p323_p5 }
  0x15   :  { %333 = shalt.err (!%p330_p9)
}
  0x16   :  { %24 = dma.hbm_to_vmem [thread:$0]  %s444_s0, 128, %s19_s21, [#allocation4], %s382_s23, %s382_s23, %s383_s24  }
  0x17   :  { %s384_s30 = smov [#allocation8]  }
  0x18   :  { %s46_s6 = sshll.u32 %s384_s30, 4  ;;  %s47_s6 = int_to_ptr.vmem [resolvable:$true] %s46_s6 }
  0x19   :  { %s342_s7 = scalar_lea.vmem %s47_s6, 256  ;;  %p347_p11 = scmp.lt.s32.totalorder %s47_s6, %s47_s6 }
  0x1a   :  { %p343_p10 = scmp.ne.s32.totalorder %s47_s6, %s342_s7  ;;  %p348_p12 = scmp.lt.s32.totalorder %s342_s7, %s342_s7 }
  0x1c   :  { %p349_p13 = por %p348_p12, %p347_p11 }
  0x1e   :  { %p350_p0 = pnand %p349_p13, %p343_p10 }
  0x20   :  { %353 = shalt.err (!%p350_p0)
}
  0x21   :  { %s385_s1 = smov 128   ;;  %s386_s8 = smov 8  }
  0x22   :  { %52 = dma.hbm_to_vmem [thread:$0]  %s448_s4, 256, %s47_s6, [#allocation7], %s385_s1, %s385_s1, %s386_s8  }
  0x23   :  { %374 = dma.done.wait [#allocation4], 128  }
  0x24   :  { %375 = vsyncadd [#allocation4], 4294967168 }
  0x25   :  { %376 = dma.done.wait [#allocation7], 1280  }
  0x26   :  { %377 = vsyncadd [#allocation7], 4294966016  ;;  %v387_v0 = vmov 0.0   ;;  %vm388_vm0 = vmmov 0   ;;  %v285_v1 = vld [vmem:[#allocation6 + $0x38] sm:$0xff]   ;;  %v286_v2 = vld [vmem:[#allocation6 + $0x30] sm:$0xff]  }
  0x27   :  { %255 = vmatprep.subr.bf16.mxu0 %v387_v0  ;;  %271 = vmatprep.mubr.msk.bf16.mxu0 %vm388_vm0, %v387_v0  ;;  %v287_v3 = vld [vmem:[#allocation6 + $0x28] sm:$0xff]   ;;  %v288_v4 = vld [vmem:[#allocation6 + $0x20] sm:$0xff]   ;;  %v289_v5 = vld [vmem:[#allocation6 + $0x18] sm:$0xff]   ;;  %s389_s13 = smov [#allocation9]  }
  0x28   :  { %256 = vmatpush3.bf16.msra.mxu0 %v285_v1  ;;  %v290_v6 = vld [vmem:[#allocation6 + $0x10] sm:$0xff]   ;;  %v291_v7 = vld [vmem:[#allocation6 + $0x8] sm:$0xff]   ;;  %v292_v8 = vld [vmem:[#allocation6] sm:$0xff]   ;;  %s222_s14 = sshll.u32 %s389_s13, 4  ;;  %s223_s14 = int_to_ptr.vmem [resolvable:$true] %s222_s14 }
  0x29   :  { %257 = vmatprep.subr.bf16.mxu0 %v387_v0  ;;  %v293_v9 = vld [vmem:[#allocation3] sm:$0xff]   ;;  %v211_v14 = vld [vmem:[#allocation8] sm:$0xff]  ;;  %v212_v20 = vld [vmem:[#allocation8 + $0x8] sm:$0xff]  ;;  %p359_p2 = scmp.lt.s32.totalorder %s223_s14, %s223_s14 }
  0x2a   :  { %v244_v10 = vld [vmem:[%s446_s2] ss:$0 sm:$0xff]  ;;  %s354_s2 = scalar_lea.vmem %s223_s14, 256 }
  0x2b   :  { %v245_v12 = vld [vmem:[%s447_s3] ss:$0 sm:$0xff]  ;;  %p355_p1 = scmp.ne.s32.totalorder %s223_s14, %s354_s2  ;;  %p360_p3 = scmp.lt.s32.totalorder %s354_s2, %s354_s2 }
  0x2c   :  { %258 = vmatpush3.bf16.msra.mxu0 %v286_v2 }
  0x2d   :  { %259 = vmatprep.subr.bf16.mxu0 %v387_v0  ;;  %p361_p4 = por %p360_p3, %p359_p2 }
  0x2f   :  { %p362_p5 = pnand %p361_p4, %p355_p1 }
  0x30   :  { %260 = vmatpush3.bf16.msra.mxu0 %v287_v3 }
  0x31   :  { %261 = vmatprep.subr.bf16.mxu0 %v387_v0 }
  0x34   :  { %262 = vmatpush3.bf16.msra.mxu0 %v288_v4 }
  0x35   :  { %263 = vmatprep.subr.bf16.mxu0 %v387_v0 }
  0x38   :  { %264 = vmatpush3.bf16.msra.mxu0 %v289_v5 }
  0x39   :  { %265 = vmatprep.subr.bf16.mxu0 %v387_v0 }
  0x3c   :  { %266 = vmatpush3.bf16.msra.mxu0 %v290_v6 }
  0x3d   :  { %267 = vmatprep.subr.bf16.mxu0 %v387_v0 }
  0x40   :  { %268 = vmatpush3.bf16.msra.mxu0 %v291_v7 }
  0x41   :  { %269 = vmatprep.subr.bf16.mxu0 %v387_v0 }
  0x44   :  { %270 = vmatpush3.bf16.msra.mxu0 %v292_v8 }
  0x47   :  { %272 = vmatmul.mubr.bf16.vlgmr.msra.gmra.mxu0 %v293_v9 }
 0x107   :  { %v177_v11 = vpop.f32.mrf.mxu0 }
 0x108   :  { %v200_v13 = vmul.f32 %v244_v10, %v177_v11 }
 0x109   :  { %v273_v15 = vpop.f32.mrf.mxu0 }
 0x10a   :  { %v209_v16 = vadd.f32 %v245_v12, %v200_v13 }
 0x10b   :  { %v180_v17 = vpop.f32.mrf.mxu0 }
 0x10c   :  { %v213_v18 = vadd.f32 %v211_v14, %v209_v16  ;;  %v201_v19 = vmul.f32 %v244_v10, %v180_v17 }
 0x10d   :  { %v274_v21 = vpop.f32.mrf.mxu0 }
 0x10e   :  { %215 = vst [vmem:[#allocation9] sm:$0xff] %v213_v18  ;;  %v210_v22 = vadd.f32 %v245_v12, %v201_v19 }
 0x110   :  { %v214_v23 = vadd.f32 %v212_v20, %v210_v22 }
 0x112   :  { %216 = vst [vmem:[#allocation9 + $0x8] sm:$0xff] %v214_v23 }
 0x113   :  { %365 = shalt.err (!%p362_p5)
}
 0x114   :  { %228 = dma.vmem_to_hbm [thread:$0]  %s223_s14, 256, %s449_s5, [#allocation5], %s385_s1, %s385_s1, %s386_s8  }
 0x115   :  { %378 = dma.done.wait [#allocation5], 256  }
 0x116   :  { %379 = vsyncadd [#allocation5], 4294967040 }
 0x117   :  { %232 = vsyncpa [#allocation4], 1 }
 0x118   :  { %233 = vsyncpa [#allocation7], 1 }
 0x119   :  { %234 = vsyncpa [#allocation5], 1 }

</bundles_post_ra>
